<compile_context>
chip_gen: v7x
topology: tpu7x:2x2x1
jax: 0.10.0
libtpu: 0.0.40
codegen_flags: <defaults>
</compile_context>

<pallas_src>
import jax
import jax.numpy as jnp
from jax.experimental import pallas as pl
from jax.experimental.pallas import tpu as pltpu

BN_EPS = 1e-5


def _round_up(x, m):
    return (x + m - 1) // m * m


def _vmem_capacity_bytes():
    """Generation-aware VMEM capacity (v5e/v6e: 128 MiB, v7x: 64 MiB per TC)."""
    try:
        return int(pltpu.get_tpu_info().vmem_capacity_bytes)
    except Exception:
        return 64 << 20                      # conservative (v7x-safe) fallback


def _stable_sigmoid(logits, approx):
    """Numerically stable sigmoid; reciprocal routed to the EUP."""
    z = jnp.exp(-jnp.abs(logits))
    r = pl.reciprocal(1.0 + z, approx=approx)
    return jnp.where(logits >= 0.0, r, z * r)


def mlp_forward(x, params, *, use_bf16=True, tile_n=None):
    """Fused MLP forward pass as a Pallas TPU kernel.

    params = (w1, b1, g1, beta1, w2, b2, g2, beta2, wo, bo); Linear weights are
    stored as [in_features, out_features], per-feature vectors as [1, F].
    """
    (w1, b1, g1, be1, w2, b2, g2, be2, wo, bo) = params
    n, din = x.shape
    hid = w1.shape[1]
    dout = wo.shape[1]

    # ---- pad feature dims to lane-friendly multiples of 128 --------------------
    din_p = _round_up(din, 128)
    hid_p = _round_up(hid, 128)
    dout_p = _round_up(dout, 128)

    cdt = jnp.bfloat16 if use_bf16 else jnp.float32
    act_b = jnp.dtype(cdt).itemsize
    row_mult = 16 if use_bf16 else 8          # sublane multiple per dtype
    approx_recip = use_bf16                   # exact reciprocal on the f32 path
    inv_n = 1.0 / float(n)

    # ---- generation-aware VMEM budget ------------------------------------------
    vmem_cap = _vmem_capacity_bytes()
    budget = vmem_cap * 7 // 10               # what tiles/temporaries may use
    vmem_limit = vmem_cap * 9 // 10           # scoped limit passed to Mosaic

    w_resident = ((din_p * hid_p + hid_p * hid_p + hid_p * dout_p) * act_b
                  + 8 * hid_p * 4)            # biases / gammas / betas (f32)

    # ---- operand padding --------------------------------------------------------
    def pad2(a, rows, cols, dtype):
        a = a.astype(jnp.float32)
        a = jnp.pad(a, ((0, rows - a.shape[0]), (0, cols - a.shape[1])))
        return a.astype(dtype)

    def pad_weights():
        return (pad2(w1, din_p, hid_p, cdt), pad2(b1, 1, hid_p, jnp.float32),
                pad2(g1, 1, hid_p, jnp.float32), pad2(be1, 1, hid_p, jnp.float32),
                pad2(w2, hid_p, hid_p, cdt), pad2(b2, 1, hid_p, jnp.float32),
                pad2(g2, 1, hid_p, jnp.float32), pad2(be2, 1, hid_p, jnp.float32),
                pad2(wo, hid_p, dout_p, cdt), pad2(bo, 1, dout_p, jnp.float32))

    def layer(a, w_ref, b_ref):
        return (jnp.dot(a.astype(cdt), w_ref[...],
                        preferred_element_type=jnp.float32) + b_ref[...])

    # ===========================================================================
    # FAST PATH: whole (padded) batch resident in VMEM -- single grid step,
    # BN statistics computed in-register with an accurate two-pass mean/var.
    # ===========================================================================
    n_fast = _round_up(n, row_mult)
    fast_bytes = (w_resident
                  + n_fast * din_p * act_b
                  + n_fast * dout_p * 4
                  + 6 * n_fast * hid_p * 4    # h1/h1n/h2/h2n + temporaries (f32)
                  + (2 << 20))                # slack for Mosaic temporaries

    def forward_fast():
        n_pad = n_fast

        def kernel(x_ref, w1_ref, b1_ref, g1_ref, be1_ref,
                   w2_ref, b2_ref, g2_ref, be2_ref, wo_ref, bo_ref, o_ref):
            if n_pad == n:
                def bn(h, g_ref, be_ref):
                    mu = jnp.sum(h, axis=0, keepdims=True) * inv_n
                    c = h - mu
                    var = jnp.sum(c * c, axis=0, keepdims=True) * inv_n
                    scale = g_ref[...] * jax.lax.rsqrt(var + BN_EPS)
                    return c * scale + be_ref[...]
            else:
                valid = (jax.lax.broadcasted_iota(jnp.int32, (n_pad, hid_p), 0)
                         < n)

                def bn(h, g_ref, be_ref):
                    mu = (jnp.sum(jnp.where(valid, h, 0.0), axis=0,
                                  keepdims=True) * inv_n)
                    c = jnp.where(valid, h - mu, 0.0)
                    var = jnp.sum(c * c, axis=0, keepdims=True) * inv_n
                    scale = g_ref[...] * jax.lax.rsqrt(var + BN_EPS)
                    return (h - mu) * scale + be_ref[...]

            h1 = jnp.maximum(layer(x_ref[...], w1_ref, b1_ref), 0.0)
            h1n = bn(h1, g1_ref, be1_ref)
            h2 = jnp.maximum(layer(h1n, w2_ref, b2_ref), 0.0)
            h2n = bn(h2, g2_ref, be2_ref)
            # TODO(synk): Dropout(p=0.4) as identity (eval-mode semantics).
            logits = layer(h2n, wo_ref, bo_ref)
            o_ref[...] = _stable_sigmoid(logits, approx_recip)

        xp = pad2(x, n_pad, din_p, cdt)
        wts = pad_weights()

        def full(shape):
            return pl.BlockSpec(shape, lambda i: (0, 0))

        in_specs = [
            full((n_pad, din_p)),                       # x
            full((din_p, hid_p)), full((1, hid_p)),     # w1, b1
            full((1, hid_p)), full((1, hid_p)),         # g1, beta1
            full((hid_p, hid_p)), full((1, hid_p)),     # w2, b2
            full((1, hid_p)), full((1, hid_p)),         # g2, beta2
            full((hid_p, dout_p)), full((1, dout_p)),   # wo, bo
        ]

        flops = 2 * n_pad * (din_p * hid_p + hid_p * hid_p + hid_p * dout_p)
        bytes_accessed = (n_pad * din_p * act_b + w_resident
                          + n_pad * dout_p * 4)

        out = pl.pallas_call(
            kernel,
            grid=(1,),
            out_shape=jax.ShapeDtypeStruct((n_pad, dout_p), jnp.float32),
            in_specs=in_specs,
            out_specs=pl.BlockSpec((n_pad, dout_p), lambda i: (0, 0)),
            compiler_params=pltpu.CompilerParams(
                dimension_semantics=("arbitrary",),
                vmem_limit_bytes=int(vmem_limit)),
            cost_estimate=pl.CostEstimate(flops=flops,
                                          transcendentals=n_pad * dout_p,
                                          bytes_accessed=bytes_accessed),
        )(xp, *wts)
        return out[:n, :dout]

    # ===========================================================================
    # TILED FALLBACK: batch-tiled 3-pass grid (pass 0: BN1 stats, pass 1: BN2
    # stats, pass 2: normalize + output).  acc rows: [sum1, sumsq1, sum2, sumsq2];
    # bn rows: [scale1, shift1, scale2, shift2].
    # ===========================================================================
    def forward_tiled():
        def step_vmem_bytes(tn_):
            return (2 * w_resident                    # resident weights (x2 bufs)
                    + 2 * tn_ * din_p * act_b         # x tile, double-buffered
                    + 2 * tn_ * dout_p * 4            # out tile, double-buffered
                    + 6 * tn_ * hid_p * 4             # f32 temporaries
                    + 8 * hid_p * 4                   # stats + folded-BN scratch
                    + (2 << 20))

        if tile_n is None:
            tn = 1024                                 # prefer long M tiles
            while tn > 16 and step_vmem_bytes(tn) > budget:
                tn //= 2
        else:
            tn = _round_up(max(int(tile_n), row_mult), row_mult)
        tn = max(row_mult, min(tn, _round_up(n, row_mult)))
        tn = _round_up(tn, row_mult)
        n_pad = _round_up(n, tn)
        num_tiles = n_pad // tn

        xp = pad2(x, n_pad, din_p, cdt)
        wts = pad_weights()

        def kernel(x_ref, w1_ref, b1_ref, g1_ref, be1_ref,
                   w2_ref, b2_ref, g2_ref, be2_ref,
                   wo_ref, bo_ref, o_ref, acc_ref, bn_ref):
            p = pl.program_id(0)
            i = pl.program_id(1)

            def masked(h):
                # zero padded batch rows so they don't pollute BN statistics;
                # compiled out entirely when there is no batch padding.
                if n_pad == n:
                    return h
                rows = (jax.lax.broadcasted_iota(jnp.int32, (tn, hid_p), 0)
                        + i * tn)
                return jnp.where(rows < n, h, 0.0)

            def accumulate(row, h):
                hm = masked(h)
                stats = jnp.concatenate(
                    [jnp.sum(hm, axis=0, keepdims=True),
                     jnp.sum(hm * hm, axis=0, keepdims=True)], axis=0)
                acc_ref[row:row + 2, :] = acc_ref[row:row + 2, :] + stats

            # layer1 + ReLU (recomputed each pass; cheaper than an HBM stash at
            # these widths -- see TODO above for the large-batch stash variant)
            h1 = jnp.maximum(layer(x_ref[...], w1_ref, b1_ref), 0.0)

            # ---- pass 0: accumulate BN1 batch statistics -----------------------
            @pl.when(p == 0)
            def _():
                @pl.when(i == 0)
                def _():
                    acc_ref[...] = jnp.zeros_like(acc_ref)
                accumulate(0, h1)

            # ---- fold BN1 into scale/shift once, at the start of pass 1 --------
            @pl.when((p == 1) & (i == 0))
            def _():
                mu = acc_ref[0:1, :] * inv_n
                var = jnp.maximum(acc_ref[1:2, :] * inv_n - mu * mu, 0.0)
                scale = g1_ref[...] * jax.lax.rsqrt(var + BN_EPS)
                bn_ref[0:1, :] = scale
                bn_ref[1:2, :] = be1_ref[...] - mu * scale

            # ---- fold BN2 into scale/shift once, at the start of pass 2 --------
            @pl.when((p == 2) & (i == 0))
            def _():
                mu = acc_ref[2:3, :] * inv_n
                var = jnp.maximum(acc_ref[3:4, :] * inv_n - mu * mu, 0.0)
                scale = g2_ref[...] * jax.lax.rsqrt(var + BN_EPS)
                bn_ref[2:3, :] = scale
                bn_ref[3:4, :] = be2_ref[...] - mu * scale

            # ---- passes 1 & 2: BN1 -> layer2 + ReLU -----------------------------
            @pl.when(p >= 1)
            def _():
                h1n = h1 * bn_ref[0:1, :] + bn_ref[1:2, :]
                h2 = jnp.maximum(layer(h1n, w2_ref, b2_ref), 0.0)

                @pl.when(p == 1)
                def _():
                    accumulate(2, h2)

                @pl.when(p == 2)
                def _():
                    h2n = h2 * bn_ref[2:3, :] + bn_ref[3:4, :]
                    # TODO(synk): Dropout(p=0.4) as identity (eval semantics).
                    logits = layer(h2n, wo_ref, bo_ref)
                    o_ref[...] = _stable_sigmoid(logits, approx_recip)

        def resident(shape):
            # TODO(synk): pipeline_mode=pl.Buffered(1) would halve resident-weight
            #             VMEM on v7x; left at default double-buffering here.
            return pl.BlockSpec(shape, lambda p, i: (0, 0))

        in_specs = [
            pl.BlockSpec((tn, din_p), lambda p, i: (i, 0)),     # x (batch-tiled)
            resident((din_p, hid_p)), resident((1, hid_p)),     # w1, b1
            resident((1, hid_p)), resident((1, hid_p)),         # g1, beta1
            resident((hid_p, hid_p)), resident((1, hid_p)),     # w2, b2
            resident((1, hid_p)), resident((1, hid_p)),         # g2, beta2
            resident((hid_p, dout_p)), resident((1, dout_p)),   # wo, bo
        ]
        # Output stays pinned to block 0 during the stats passes (p < 2), so the
        # never-written out tile is never DMA'd back to HBM; only pass 2 streams
        # real output tiles (1x writeback instead of 3x).
        out_spec = pl.BlockSpec((tn, dout_p), lambda p, i: (i * (p // 2), 0))

        flops = 2 * n_pad * (3 * din_p * hid_p + 2 * hid_p * hid_p
                             + hid_p * dout_p)
        bytes_accessed = (3 * n_pad * din_p * act_b + w_resident
                          + n_pad * dout_p * 4)

        out = pl.pallas_call(
            kernel,
            grid=(3, num_tiles),
            out_shape=jax.ShapeDtypeStruct((n_pad, dout_p), jnp.float32),
            in_specs=in_specs,
            out_specs=out_spec,
            scratch_shapes=[pltpu.VMEM((4, hid_p), jnp.float32),   # BN sum/sumsq
                            pltpu.VMEM((4, hid_p), jnp.float32)],  # folded scale/shift
            compiler_params=pltpu.CompilerParams(
                # Both axes "arbitrary": cross-tile BN stats accumulate in shared
                # scratch, so tiles must run sequentially (no megacore split).
                dimension_semantics=("arbitrary", "arbitrary"),
                vmem_limit_bytes=int(vmem_limit)),
            cost_estimate=pl.CostEstimate(flops=flops,
                                          transcendentals=n_pad * dout_p,
                                          bytes_accessed=bytes_accessed),
        )(xp, *wts)
        return out[:n, :dout]

    if tile_n is None and fast_bytes <= budget:
        return forward_fast()
    return forward_tiled()


def make_params(key, input_dim, hidden_dim, output_dim):
    """Deterministic synthetic parameters (Linear weights stored as [in, out])."""
    ks = jax.random.split(key, 6)
    w1 = jax.random.normal(ks[0], (input_dim, hidden_dim), jnp.float32) * 0.1
    b1 = jax.random.normal(ks[1], (1, hidden_dim), jnp.float32) * 0.1
    w2 = jax.random.normal(ks[2], (hidden_dim, hidden_dim), jnp.float32) * 0.1
    b2 = jax.random.normal(ks[3], (1, hidden_dim), jnp.float32) * 0.1
    wo = jax.random.normal(ks[4], (hidden_dim, output_dim), jnp.float32) * 0.1
    bo = jax.random.normal(ks[5], (1, output_dim), jnp.float32) * 0.1
    # BatchNorm affine params at PyTorch init values: gamma=1, beta=0.
    g1 = jnp.ones((1, hidden_dim), jnp.float32)
    beta1 = jnp.zeros((1, hidden_dim), jnp.float32)
    g2 = jnp.ones((1, hidden_dim), jnp.float32)
    beta2 = jnp.zeros((1, hidden_dim), jnp.float32)
    return (w1, b1, g1, beta1, w2, b2, g2, beta2, wo, bo)


def mlp_ref(x, params):
    """Pure-JAX f32 reference (PyTorch train-mode BatchNorm semantics)."""
    (w1, b1, g1, beta1, w2, b2, g2, beta2, wo, bo) = params

    def bn(h, g, b):
        mu = jnp.mean(h, axis=0, keepdims=True)
        var = jnp.mean((h - mu) ** 2, axis=0, keepdims=True)
        return (h - mu) / jnp.sqrt(var + BN_EPS) * g + b

    h = jnp.maximum(x @ w1 + b1, 0.0)
    h = bn(h, g1, beta1)
    h = jnp.maximum(h @ w2 + b2, 0.0)
    h = bn(h, g2, beta2)
    out = h @ wo + bo
    return jax.nn.sigmoid(out)


if __name__ == "__main__":
    # Small shapes consistent with the module's forward.
    batch, input_dim, hidden_dim, output_dim = 8, 16, 32, 4

    key = jax.random.PRNGKey(0)
    kx, kp = jax.random.split(key)
    x = jax.random.normal(kx, (batch, input_dim), jnp.float32)
    params = make_params(kp, input_dim, hidden_dim, output_dim)
    ref = mlp_ref(x, params)

    # 1) fast path, exact precision (f32 MXU operands, no batch padding)
    out_f32 = jax.block_until_ready(mlp_forward(x, params, use_bf16=False))
    assert out_f32.shape == (batch, output_dim)
    assert jnp.allclose(out_f32, ref, atol=1e-4, rtol=1e-4), "f32 fast-path mismatch"

    # 2) fast path, bf16 MXU operands (f32 accumulation / BN / sigmoid) + padding
    out_bf16 = jax.block_until_ready(mlp_forward(x, params, use_bf16=True))
    assert out_bf16.shape == (batch, output_dim)
    assert jnp.allclose(out_bf16, ref, atol=2e-2, rtol=2e-2), "bf16 fast-path mismatch"

    # 3) fast path with padded batch rows (mask path) at exact precision
    x3 = jax.random.normal(jax.random.PRNGKey(3), (10, input_dim), jnp.float32)
    ref3 = mlp_ref(x3, params)
    out3 = jax.block_until_ready(mlp_forward(x3, params, use_bf16=False))
    assert jnp.allclose(out3, ref3, atol=1e-4, rtol=1e-4), "padded fast-path mismatch"

    # 4) multi-tile 3-pass path with batch padding (cross-tile BatchNorm)
    kx2, kp2 = jax.random.split(jax.random.PRNGKey(1))
    x2 = jax.random.normal(kx2, (40, input_dim), jnp.float32)
    params2 = make_params(kp2, input_dim, hidden_dim, output_dim)
    ref2 = mlp_ref(x2, params2)
    out2 = jax.block_until_ready(mlp_forward(x2, params2, use_bf16=False, tile_n=16))
    assert jnp.allclose(out2, ref2, atol=1e-4, rtol=1e-4), "multi-tile (masked) mismatch"

    # 5) multi-tile 3-pass path without padding (unmasked stats branch)
    x4 = jax.random.normal(jax.random.PRNGKey(2), (32, input_dim), jnp.float32)
    ref4 = mlp_ref(x4, params)
    out4 = jax.block_until_ready(mlp_forward(x4, params, use_bf16=False, tile_n=16))
    assert jnp.allclose(out4, ref4, atol=1e-4, rtol=1e-4), "multi-tile (full) mismatch"

    print("KERNEL_OK")
</pallas_src>

<mosaic_0001>
module attributes {stable_mosaic.version = 11 : i64} {
  func.func @kernel(%arg0: i32, %arg1: memref<8x128xf32, #tpu.memory_space<vmem>>, %arg2: memref<128x128xf32, #tpu.memory_space<vmem>>, %arg3: memref<1x128xf32, #tpu.memory_space<vmem>>, %arg4: memref<1x128xf32, #tpu.memory_space<vmem>>, %arg5: memref<1x128xf32, #tpu.memory_space<vmem>>, %arg6: memref<128x128xf32, #tpu.memory_space<vmem>>, %arg7: memref<1x128xf32, #tpu.memory_space<vmem>>, %arg8: memref<1x128xf32, #tpu.memory_space<vmem>>, %arg9: memref<1x128xf32, #tpu.memory_space<vmem>>, %arg10: memref<128x128xf32, #tpu.memory_space<vmem>>, %arg11: memref<1x128xf32, #tpu.memory_space<vmem>>, %arg12: memref<8x128xf32, #tpu.memory_space<vmem>>) attributes {dimension_semantics = [#tpu.dimension_semantics<arbitrary>], iteration_bounds = array<i64: 1>, scalar_prefetch = 0 : i64, scratch_operands = 0 : i64, tpu.core_type = #tpu.core_type<tc>, window_params = [{pipeline_mode = #tpu.pipeline_mode<synchronous>, transform_indices = @transform_0, window_bounds = array<i64: 8, 128>}, {pipeline_mode = #tpu.pipeline_mode<synchronous>, transform_indices = @transform_1, window_bounds = array<i64: 128, 128>}, {pipeline_mode = #tpu.pipeline_mode<synchronous>, transform_indices = @transform_2, window_bounds = array<i64: 1, 128>}, {pipeline_mode = #tpu.pipeline_mode<synchronous>, transform_indices = @transform_3, window_bounds = array<i64: 1, 128>}, {pipeline_mode = #tpu.pipeline_mode<synchronous>, transform_indices = @transform_4, window_bounds = array<i64: 1, 128>}, {pipeline_mode = #tpu.pipeline_mode<synchronous>, transform_indices = @transform_5, window_bounds = array<i64: 128, 128>}, {pipeline_mode = #tpu.pipeline_mode<synchronous>, transform_indices = @transform_6, window_bounds = array<i64: 1, 128>}, {pipeline_mode = #tpu.pipeline_mode<synchronous>, transform_indices = @transform_7, window_bounds = array<i64: 1, 128>}, {pipeline_mode = #tpu.pipeline_mode<synchronous>, transform_indices = @transform_8, window_bounds = array<i64: 1, 128>}, {pipeline_mode = #tpu.pipeline_mode<synchronous>, transform_indices = @transform_9, window_bounds = array<i64: 128, 128>}, {pipeline_mode = #tpu.pipeline_mode<synchronous>, transform_indices = @transform_10, window_bounds = array<i64: 1, 128>}, {pipeline_mode = #tpu.pipeline_mode<synchronous>, transform_indices = @transform_11, window_bounds = array<i64: 8, 128>}]} {
    %c0 = arith.constant 0 : index
    %c0_0 = arith.constant 0 : index
    %0 = vector.load %arg1[%c0, %c0_0] : memref<8x128xf32, #tpu.memory_space<vmem>>, vector<8x128xf32>
    %c0_1 = arith.constant 0 : index
    %c0_2 = arith.constant 0 : index
    %1 = vector.load %arg2[%c0_1, %c0_2] : memref<128x128xf32, #tpu.memory_space<vmem>>, vector<128x128xf32>
    %cst = arith.constant dense<0.000000e+00> : vector<8x128xf32>
    %2 = tpu.matmul %0, %1, %cst {dimension_numbers = #tpu.dot_dimension_numbers<[1], [0], [0], [1], [0, 0, 1, 1], [], []>} : vector<8x128xf32>, vector<128x128xf32>, vector<8x128xf32> -> vector<8x128xf32>
    %c0_3 = arith.constant 0 : index
    %c0_4 = arith.constant 0 : index
    %3 = vector.load %arg3[%c0_3, %c0_4] : memref<1x128xf32, #tpu.memory_space<vmem>>, vector<1x128xf32>
    %4 = vector.broadcast %3 : vector<1x128xf32> to vector<8x128xf32>
    %5 = arith.addf %2, %4 : vector<8x128xf32>
    %cst_5 = arith.constant 0.000000e+00 : f32
    %6 = vector.broadcast %cst_5 : f32 to vector<8x128xf32>
    %7 = arith.maximumf %5, %6 : vector<8x128xf32>
    %cst_6 = arith.constant dense<0.000000e+00> : vector<128xf32>
    %8 = vector.multi_reduction <add>, %7, %cst_6 [0] : vector<8x128xf32> to vector<128xf32>
    %9 = vector.shape_cast %8 : vector<128xf32> to vector<1x128xf32>
    %cst_7 = arith.constant 1.250000e-01 : f32
    %10 = vector.broadcast %cst_7 : f32 to vector<1x128xf32>
    %11 = arith.mulf %9, %10 : vector<1x128xf32>
    %12 = vector.broadcast %11 : vector<1x128xf32> to vector<8x128xf32>
    %13 = arith.subf %7, %12 : vector<8x128xf32>
    %14 = arith.mulf %13, %13 : vector<8x128xf32>
    %cst_8 = arith.constant dense<0.000000e+00> : vector<128xf32>
    %15 = vector.multi_reduction <add>, %14, %cst_8 [0] : vector<8x128xf32> to vector<128xf32>
    %16 = vector.shape_cast %15 : vector<128xf32> to vector<1x128xf32>
    %cst_9 = arith.constant 1.250000e-01 : f32
    %17 = vector.broadcast %cst_9 : f32 to vector<1x128xf32>
    %18 = arith.mulf %16, %17 : vector<1x128xf32>
    %c0_10 = arith.constant 0 : index
    %c0_11 = arith.constant 0 : index
    %19 = vector.load %arg4[%c0_10, %c0_11] : memref<1x128xf32, #tpu.memory_space<vmem>>, vector<1x128xf32>
    %cst_12 = arith.constant 9.99999974E-6 : f32
    %20 = vector.broadcast %cst_12 : f32 to vector<1x128xf32>
    %21 = arith.addf %18, %20 : vector<1x128xf32>
    %22 = math.rsqrt %21 : vector<1x128xf32>
    %23 = arith.mulf %19, %22 : vector<1x128xf32>
    %24 = vector.broadcast %23 : vector<1x128xf32> to vector<8x128xf32>
    %25 = arith.mulf %13, %24 : vector<8x128xf32>
    %c0_13 = arith.constant 0 : index
    %c0_14 = arith.constant 0 : index
    %26 = vector.load %arg5[%c0_13, %c0_14] : memref<1x128xf32, #tpu.memory_space<vmem>>, vector<1x128xf32>
    %27 = vector.broadcast %26 : vector<1x128xf32> to vector<8x128xf32>
    %28 = arith.addf %25, %27 : vector<8x128xf32>
    %c0_15 = arith.constant 0 : index
    %c0_16 = arith.constant 0 : index
    %29 = vector.load %arg6[%c0_15, %c0_16] : memref<128x128xf32, #tpu.memory_space<vmem>>, vector<128x128xf32>
    %cst_17 = arith.constant dense<0.000000e+00> : vector<8x128xf32>
    %30 = tpu.matmul %28, %29, %cst_17 {dimension_numbers = #tpu.dot_dimension_numbers<[1], [0], [0], [1], [0, 0, 1, 1], [], []>} : vector<8x128xf32>, vector<128x128xf32>, vector<8x128xf32> -> vector<8x128xf32>
    %c0_18 = arith.constant 0 : index
    %c0_19 = arith.constant 0 : index
    %31 = vector.load %arg7[%c0_18, %c0_19] : memref<1x128xf32, #tpu.memory_space<vmem>>, vector<1x128xf32>
    %32 = vector.broadcast %31 : vector<1x128xf32> to vector<8x128xf32>
    %33 = arith.addf %30, %32 : vector<8x128xf32>
    %cst_20 = arith.constant 0.000000e+00 : f32
    %34 = vector.broadcast %cst_20 : f32 to vector<8x128xf32>
    %35 = arith.maximumf %33, %34 : vector<8x128xf32>
    %cst_21 = arith.constant dense<0.000000e+00> : vector<128xf32>
    %36 = vector.multi_reduction <add>, %35, %cst_21 [0] : vector<8x128xf32> to vector<128xf32>
    %37 = vector.shape_cast %36 : vector<128xf32> to vector<1x128xf32>
    %cst_22 = arith.constant 1.250000e-01 : f32
    %38 = vector.broadcast %cst_22 : f32 to vector<1x128xf32>
    %39 = arith.mulf %37, %38 : vector<1x128xf32>
    %40 = vector.broadcast %39 : vector<1x128xf32> to vector<8x128xf32>
    %41 = arith.subf %35, %40 : vector<8x128xf32>
    %42 = arith.mulf %41, %41 : vector<8x128xf32>
    %cst_23 = arith.constant dense<0.000000e+00> : vector<128xf32>
    %43 = vector.multi_reduction <add>, %42, %cst_23 [0] : vector<8x128xf32> to vector<128xf32>
    %44 = vector.shape_cast %43 : vector<128xf32> to vector<1x128xf32>
    %cst_24 = arith.constant 1.250000e-01 : f32
    %45 = vector.broadcast %cst_24 : f32 to vector<1x128xf32>
    %46 = arith.mulf %44, %45 : vector<1x128xf32>
    %c0_25 = arith.constant 0 : index
    %c0_26 = arith.constant 0 : index
    %47 = vector.load %arg8[%c0_25, %c0_26] : memref<1x128xf32, #tpu.memory_space<vmem>>, vector<1x128xf32>
    %cst_27 = arith.constant 9.99999974E-6 : f32
    %48 = vector.broadcast %cst_27 : f32 to vector<1x128xf32>
    %49 = arith.addf %46, %48 : vector<1x128xf32>
    %50 = math.rsqrt %49 : vector<1x128xf32>
    %51 = arith.mulf %47, %50 : vector<1x128xf32>
    %52 = vector.broadcast %51 : vector<1x128xf32> to vector<8x128xf32>
    %53 = arith.mulf %41, %52 : vector<8x128xf32>
    %c0_28 = arith.constant 0 : index
    %c0_29 = arith.constant 0 : index
    %54 = vector.load %arg9[%c0_28, %c0_29] : memref<1x128xf32, #tpu.memory_space<vmem>>, vector<1x128xf32>
    %55 = vector.broadcast %54 : vector<1x128xf32> to vector<8x128xf32>
    %56 = arith.addf %53, %55 : vector<8x128xf32>
    %c0_30 = arith.constant 0 : index
    %c0_31 = arith.constant 0 : index
    %57 = vector.load %arg10[%c0_30, %c0_31] : memref<128x128xf32, #tpu.memory_space<vmem>>, vector<128x128xf32>
    %cst_32 = arith.constant dense<0.000000e+00> : vector<8x128xf32>
    %58 = tpu.matmul %56, %57, %cst_32 {dimension_numbers = #tpu.dot_dimension_numbers<[1], [0], [0], [1], [0, 0, 1, 1], [], []>} : vector<8x128xf32>, vector<128x128xf32>, vector<8x128xf32> -> vector<8x128xf32>
    %c0_33 = arith.constant 0 : index
    %c0_34 = arith.constant 0 : index
    %59 = vector.load %arg11[%c0_33, %c0_34] : memref<1x128xf32, #tpu.memory_space<vmem>>, vector<1x128xf32>
    %60 = vector.broadcast %59 : vector<1x128xf32> to vector<8x128xf32>
    %61 = arith.addf %58, %60 : vector<8x128xf32>
    %62 = math.absf %61 : vector<8x128xf32>
    %cst_35 = arith.constant 0.000000e+00 : f32
    %63 = vector.broadcast %cst_35 : f32 to vector<8x128xf32>
    %64 = arith.subf %63, %62 : vector<8x128xf32>
    %65 = math.exp %64 : vector<8x128xf32>
    %cst_36 = arith.constant 1.000000e+00 : f32
    %66 = vector.broadcast %cst_36 : f32 to vector<8x128xf32>
    %67 = arith.addf %66, %65 : vector<8x128xf32>
    %68 = tpu.reciprocal %67 : vector<8x128xf32> -> vector<8x128xf32>
    %cst_37 = arith.constant 0.000000e+00 : f32
    %69 = vector.broadcast %cst_37 : f32 to vector<8x128xf32>
    %70 = arith.cmpf oge, %61, %69 : vector<8x128xf32>
    %71 = arith.mulf %65, %68 : vector<8x128xf32>
    %72 = arith.select %70, %68, %71 : vector<8x128xi1>, vector<8x128xf32>
    %c0_38 = arith.constant 0 : index
    %c0_39 = arith.constant 0 : index
    %73 = vector.load %arg12[%c0_38, %c0_39] : memref<8x128xf32, #tpu.memory_space<vmem>>, vector<8x128xf32>
    tpu.vector_store %arg12[%c0_38, %c0_39], %72 {strides = array<i32>} : memref<8x128xf32, #tpu.memory_space<vmem>>, vector<8x128xf32>,
    return
  }
  func.func @transform_0(%arg0: i32) -> (i32, i32) {
    %c0_i32 = arith.constant 0 : i32
    %c0_i32_0 = arith.constant 0 : i32
    %c0_i32_1 = arith.constant 0 : i32
    return %c0_i32, %c0_i32_0 : i32, i32
  }
  func.func @transform_1(%arg0: i32) -> (i32, i32) {
    %c0_i32 = arith.constant 0 : i32
    %c0_i32_0 = arith.constant 0 : i32
    %c0_i32_1 = arith.constant 0 : i32
    return %c0_i32, %c0_i32_0 : i32, i32
  }
  func.func @transform_2(%arg0: i32) -> (i32, i32) {
    %c0_i32 = arith.constant 0 : i32
    %c0_i32_0 = arith.constant 0 : i32
    %c0_i32_1 = arith.constant 0 : i32
    return %c0_i32, %c0_i32_0 : i32, i32
  }
  func.func @transform_3(%arg0: i32) -> (i32, i32) {
    %c0_i32 = arith.constant 0 : i32
    %c0_i32_0 = arith.constant 0 : i32
    %c0_i32_1 = arith.constant 0 : i32
    return %c0_i32, %c0_i32_0 : i32, i32
  }
  func.func @transform_4(%arg0: i32) -> (i32, i32) {
    %c0_i32 = arith.constant 0 : i32
    %c0_i32_0 = arith.constant 0 : i32
    %c0_i32_1 = arith.constant 0 : i32
    return %c0_i32, %c0_i32_0 : i32, i32
  }
  func.func @transform_5(%arg0: i32) -> (i32, i32) {
    %c0_i32 = arith.constant 0 : i32
    %c0_i32_0 = arith.constant 0 : i32
    %c0_i32_1 = arith.constant 0 : i32
    return %c0_i32, %c0_i32_0 : i32, i32
  }
  func.func @transform_6(%arg0: i32) -> (i32, i32) {
    %c0_i32 = arith.constant 0 : i32
    %c0_i32_0 = arith.constant 0 : i32
    %c0_i32_1 = arith.constant 0 : i32
    return %c0_i32, %c0_i32_0 : i32, i32
  }
  func.func @transform_7(%arg0: i32) -> (i32, i32) {
    %c0_i32 = arith.constant 0 : i32
    %c0_i32_0 = arith.constant 0 : i32
    %c0_i32_1 = arith.constant 0 : i32
    return %c0_i32, %c0_i32_0 : i32, i32
  }
  func.func @transform_8(%arg0: i32) -> (i32, i32) {
    %c0_i32 = arith.constant 0 : i32
    %c0_i32_0 = arith.constant 0 : i32
    %c0_i32_1 = arith.constant 0 : i32
    return %c0_i32, %c0_i32_0 : i32, i32
  }
  func.func @transform_9(%arg0: i32) -> (i32, i32) {
    %c0_i32 = arith.constant 0 : i32
    %c0_i32_0 = arith.constant 0 : i32
    %c0_i32_1 = arith.constant 0 : i32
    return %c0_i32, %c0_i32_0 : i32, i32
  }
  func.func @transform_10(%arg0: i32) -> (i32, i32) {
    %c0_i32 = arith.constant 0 : i32
    %c0_i32_0 = arith.constant 0 : i32
    %c0_i32_1 = arith.constant 0 : i32
    return %c0_i32, %c0_i32_0 : i32, i32
  }
  func.func @transform_11(%arg0: i32) -> (i32, i32) {
    %c0_i32 = arith.constant 0 : i32
    %c0_i32_0 = arith.constant 0 : i32
    %c0_i32_1 = arith.constant 0 : i32
    return %c0_i32, %c0_i32_0 : i32, i32
  }
}

</mosaic_0001>

<bundles_post_ra>
// kernel: tpu_custom_call.1
= control target key start
LH: loop header
LB: loop body
LE: loop exit
PB: predicated region body
PF: predicated region fallthrough
CT: control target
= control target key end

     0   :  { %16 = vsyncpa [#allocation3], 0  ;;  %s1034_s0 = inlined_call_operand.hbm [shape: f32[8,128], index: 0, kind: input, shape index: {}]   ;;  %s1035_s1 = inlined_call_operand.hbm [shape: f32[128,128], index: 1, kind: input, shape index: {}]   ;;  %s1036_s2 = inlined_call_operand.vmem [shape: f32[1,128], index: 2, kind: input, shape index: {}]   ;;  %s1037_s3 = inlined_call_operand.vmem [shape: f32[1,128], index: 3, kind: input, shape index: {}]   ;;  %s1038_s4 = inlined_call_operand.vmem [shape: f32[1,128], index: 4, kind: input, shape index: {}]   ;;  %s1039_s5 = inlined_call_operand.hbm [shape: f32[128,128], index: 5, kind: input, shape index: {}]   ;;  %s1040_s6 = inlined_call_operand.vmem [shape: f32[1,128], index: 6, kind: input, shape index: {}]   ;;  %s1041_s7 = inlined_call_operand.vmem [shape: f32[1,128], index: 7, kind: input, shape index: {}]   ;;  %s1042_s8 = inlined_call_operand.vmem [shape: f32[1,128], index: 8, kind: input, shape index: {}]   ;;  %s1043_s9 = inlined_call_operand.hbm [shape: f32[128,128], index: 9, kind: input, shape index: {}]   ;;  %s1044_s10 = inlined_call_operand.vmem [shape: f32[1,128], index: 10, kind: input, shape index: {}]   ;;  %s1045_s11 = inlined_call_operand.hbm [shape: f32[8,128], index: 11, kind: output, shape index: {}]  }
   0x1   :  { %17 = vsyncpa [#allocation6], 0 }
   0x2   :  { %18 = vsyncpa [#allocation9], 0 }
   0x3   :  { %19 = vsyncpa [#allocation4], 0  ;;  %s840_s17 = smov [#allocation5]   ;;  %s722_s21 = scalar_lea.hbm %s1035_s1, 2048 }
   0x4   :  { %s35_s18 = sshll.u32 %s840_s17, 4  ;;  %p723_p0 = scmp.ne.s32.totalorder %s1035_s1, %s722_s21  ;;  %s36_s18 = int_to_ptr.vmem [resolvable:$true] %s35_s18 }
   0x5   :  { %p726_p1 = scmp.lt.u32.totalorder %s722_s21, %s1035_s1 }
   0x7   :  { %p728_p2 = pnand %p726_p1, %p723_p0 }
   0x9   :  { %731 = shalt.err (!%p728_p2)
}
   0xa   :  { %s732_s26 = scalar_lea.vmem %s36_s18, 2048  ;;  %p737_p4 = scmp.lt.s32.totalorder %s36_s18, %s36_s18 }
   0xb   :  { %p733_p3 = scmp.ne.s32.totalorder %s36_s18, %s732_s26  ;;  %p738_p5 = scmp.lt.s32.totalorder %s732_s26, %s732_s26 }
   0xd   :  { %p739_p6 = por %p738_p5, %p737_p4 }
   0xf   :  { %p740_p7 = pnand %p739_p6, %p733_p3 }
  0x11   :  { %743 = shalt.err (!%p740_p7)
}
  0x12   :  { %s841_s27 = smov 128   ;;  %s842_s28 = smov 8  }
  0x13   :  { %41 = dma.hbm_to_vmem [thread:$0]  %s1035_s1, 2048, %s36_s18, [#allocation6], %s841_s27, %s841_s27, %s842_s28  }
  0x14   :  { %s843_s12 = smov [#allocation2]   ;;  %s844_s14 = smov [#allocation7]  }
  0x15   :  { %s26_s13 = sshll.u32 %s843_s12, 4  ;;  %s53_s15 = sshll.u32 %s844_s14, 4  ;;  %s27_s13 = int_to_ptr.vmem [resolvable:$true] %s26_s13  ;;  %s54_s15 = int_to_ptr.vmem [resolvable:$true] %s53_s15 }
  0x16   :  { %s744_s19 = scalar_lea.hbm %s1034_s0, 128 }
  0x17   :  { %p745_p8 = scmp.ne.s32.totalorder %s1034_s0, %s744_s19  ;;  %p748_p9 = scmp.lt.u32.totalorder %s744_s19, %s1034_s0 }
  0x19   :  { %p750_p10 = pnand %p748_p9, %p745_p8 }
  0x1b   :  { %753 = shalt.err (!%p750_p10)
}
  0x1c   :  { %s754_s1 = scalar_lea.vmem %s27_s13, 128  ;;  %p759_p12 = scmp.lt.s32.totalorder %s27_s13, %s27_s13 }
  0x1d   :  { %p755_p11 = scmp.ne.s32.totalorder %s27_s13, %s754_s1  ;;  %p760_p13 = scmp.lt.s32.totalorder %s754_s1, %s754_s1 }
  0x1f   :  { %p761_p0 = por %p760_p13, %p759_p12 }
  0x21   :  { %p762_p1 = pnand %p761_p0, %p755_p11 }
  0x23   :  { %765 = shalt.err (!%p762_p1)
}
  0x24   :  { %29 = dma.hbm_to_vmem [thread:$0]  %s1034_s0, 128, %s27_s13, [#allocation3]  }
  0x25   :  { %s766_s29 = scalar_lea.hbm %s1039_s5, 2048 }
  0x26   :  { %p767_p2 = scmp.ne.s32.totalorder %s1039_s5, %s766_s29  ;;  %p770_p3 = scmp.lt.u32.totalorder %s766_s29, %s1039_s5 }
  0x28   :  { %p772_p4 = pnand %p770_p3, %p767_p2 }
  0x2a   :  { %775 = shalt.err (!%p772_p4)
}
  0x2b   :  { %s776_s17 = scalar_lea.vmem %s54_s15, 2048  ;;  %p781_p6 = scmp.lt.s32.totalorder %s54_s15, %s54_s15 }
  0x2c   :  { %p777_p5 = scmp.ne.s32.totalorder %s54_s15, %s776_s17  ;;  %p782_p7 = scmp.lt.s32.totalorder %s776_s17, %s776_s17 }
  0x2e   :  { %p783_p8 = por %p782_p7, %p781_p6 }
  0x30   :  { %p784_p9 = pnand %p783_p8, %p777_p5 }
  0x32   :  { %787 = shalt.err (!%p784_p9)
}
  0x33   :  { %59 = dma.hbm_to_vmem [thread:$0]  %s1039_s5, 2048, %s54_s15, [#allocation6], %s841_s27, %s841_s27, %s842_s28  }
  0x34   :  { %s845_s19 = smov [#allocation8]   ;;  %s788_s23 = scalar_lea.hbm %s1043_s9, 2048 }
  0x35   :  { %s71_s20 = sshll.u32 %s845_s19, 4  ;;  %p789_p10 = scmp.ne.s32.totalorder %s1043_s9, %s788_s23  ;;  %s72_s20 = int_to_ptr.vmem [resolvable:$true] %s71_s20 }
  0x36   :  { %p792_p11 = scmp.lt.u32.totalorder %s788_s23, %s1043_s9 }
  0x38   :  { %p794_p12 = pnand %p792_p11, %p789_p10 }
  0x3a   :  { %797 = shalt.err (!%p794_p12)
}
  0x3b   :  { %s798_s26 = scalar_lea.vmem %s72_s20, 2048  ;;  %p803_p0 = scmp.lt.s32.totalorder %s72_s20, %s72_s20 }
  0x3c   :  { %p799_p13 = scmp.ne.s32.totalorder %s72_s20, %s798_s26  ;;  %p804_p1 = scmp.lt.s32.totalorder %s798_s26, %s798_s26 }
  0x3e   :  { %p805_p2 = por %p804_p1, %p803_p0 }
  0x40   :  { %p806_p3 = pnand %p805_p2, %p799_p13 }
  0x42   :  { %809 = shalt.err (!%p806_p3)
}
  0x43   :  { %77 = dma.hbm_to_vmem [thread:$0]  %s1043_s9, 2048, %s72_s20, [#allocation9], %s841_s27, %s841_s27, %s842_s28  }
  0x44   :  { %832 = dma.done.wait [#allocation3], 128  }
  0x45   :  { %833 = vsyncadd [#allocation3], 4294967168 }
  0x46   :  { %834 = dma.done.wait [#allocation6], 4096  }
  0x47   :  { %835 = vsyncadd [#allocation6], 4294963200 }
  0x48   :  { %836 = dma.done.wait [#allocation9], 2048  }
  0x49   :  { %837 = vsyncadd [#allocation9], 4294965248  ;;  %v846_v0 = vmov 0.0|0.0   ;;  %vm847_vm0 = vmmov 0   ;;  %v848_v1 = vmov 0.0   ;;  %v93_v2 = vld [vmem:[#allocation5] sm:$0xff] }
  0x4a   :  { %632 = vmatprep.subr.bf16.mxu0 %v846_v0  ;;  %559 = vmatprep.mubr.msk.f32.mxu0 %vm847_vm0, %v848_v1  ;;  %v94_v3 = vld [vmem:[#allocation5 + $0x8] sm:$0xff]  ;;  %v95_v4 = vld [vmem:[#allocation5 + $0x10] sm:$0xff]  ;;  %v96_v6 = vld [vmem:[#allocation5 + $0x18] sm:$0xff] }
  0x4b   :  { %656 = vmatprep.subr.bf16.mxu1 %v846_v0  ;;  %594 = vmatprep.mubr.msk.f32.mxu1 %vm847_vm0, %v848_v1  ;;  %v633_v5 = vpack.c.bf16 %v94_v3, %v93_v2  ;;  %v636_v7 = vpack.c.bf16 %v96_v6, %v95_v4  ;;  %v97_v8 = vld [vmem:[#allocation5 + $0x20] sm:$0xff]  ;;  %v98_v9 = vld [vmem:[#allocation5 + $0x28] sm:$0xff]  ;;  %v99_v11 = vld [vmem:[#allocation5 + $0x30] sm:$0xff] }
  0x4c   :  { %v639_v10 = vpack.c.bf16 %v98_v9, %v97_v8  ;;  %v100_v12 = vld [vmem:[#allocation5 + $0x38] sm:$0xff]  ;;  %v101_v14 = vld [vmem:[#allocation5 + $0x40] sm:$0xff]  ;;  %v102_v15 = vld [vmem:[#allocation5 + $0x48] sm:$0xff] }
  0x4d   :  { %634 = vmatpush3.bf16.msra.mxu0 %v633_v5  ;;  %v642_v13 = vpack.c.bf16 %v100_v12, %v99_v11  ;;  %v645_v16 = vpack.c.bf16 %v102_v15, %v101_v14  ;;  %v103_v17 = vld [vmem:[#allocation5 + $0x50] sm:$0xff]  ;;  %v104_v18 = vld [vmem:[#allocation5 + $0x58] sm:$0xff]  ;;  %v105_v20 = vld [vmem:[#allocation5 + $0x60] sm:$0xff] }
  0x4e   :  { %635 = vmatprep.subr.bf16.mxu0 %v846_v0  ;;  %v648_v19 = vpack.c.bf16 %v104_v18, %v103_v17  ;;  %v106_v21 = vld [vmem:[#allocation5 + $0x68] sm:$0xff]  ;;  %v107_v23 = vld [vmem:[#allocation5 + $0x70] sm:$0xff]  ;;  %v108_v24 = vld [vmem:[#allocation5 + $0x78] sm:$0xff] }
  0x4f   :  { %v651_v22 = vpack.c.bf16 %v106_v21, %v105_v20  ;;  %v654_v25 = vpack.c.bf16 %v108_v24, %v107_v23  ;;  %v92_v26 = vld [vmem:[#allocation2] sm:$0xff]  ;;  %v222_v27 = vld [vmem:[#allocation7] sm:$0xff]  ;;  %v223_v28 = vld [vmem:[#allocation7 + $0x8] sm:$0xff] }
  0x50   :  { %v657_v29 = vpack.c.bf16 %v223_v28, %v222_v27  ;;  %v224_v30 = vld [vmem:[#allocation7 + $0x10] sm:$0xff]  ;;  %v225_v31 = vld [vmem:[#allocation7 + $0x18] sm:$0xff]  ;;  %v226_v33 = vld [vmem:[#allocation7 + $0x20] sm:$0xff] }
  0x51   :  { %637 = vmatpush3.bf16.msra.mxu0 %v636_v7  ;;  %v660_v32 = vpack.c.bf16 %v225_v31, %v224_v30  ;;  %v227_v34 = vld [vmem:[#allocation7 + $0x28] sm:$0xff]  ;;  %v228_v36 = vld [vmem:[#allocation7 + $0x30] sm:$0xff]  ;;  %v229_v37 = vld [vmem:[#allocation7 + $0x38] sm:$0xff] }
  0x52   :  { %638 = vmatprep.subr.bf16.mxu0 %v846_v0  ;;  %658 = vmatpush3.bf16.msra.mxu1 %v657_v29  ;;  %v663_v35 = vpack.c.bf16 %v227_v34, %v226_v33  ;;  %v666_v38 = vpack.c.bf16 %v229_v37, %v228_v36  ;;  %v230_v39 = vld [vmem:[#allocation7 + $0x40] sm:$0xff]  ;;  %v231_v40 = vld [vmem:[#allocation7 + $0x48] sm:$0xff]  ;;  %v232_v42 = vld [vmem:[#allocation7 + $0x50] sm:$0xff] }
  0x53   :  { %659 = vmatprep.subr.bf16.mxu1 %v846_v0  ;;  %v669_v41 = vpack.c.bf16 %v231_v40, %v230_v39  ;;  %v233_v43 = vld [vmem:[#allocation7 + $0x58] sm:$0xff]  ;;  %v234_v45 = vld [vmem:[#allocation7 + $0x60] sm:$0xff]  ;;  %v235_v46 = vld [vmem:[#allocation7 + $0x68] sm:$0xff] }
  0x54   :  { %v672_v44 = vpack.c.bf16 %v233_v43, %v232_v42  ;;  %v675_v47 = vpack.c.bf16 %v235_v46, %v234_v45  ;;  %v236_v48 = vld [vmem:[#allocation7 + $0x70] sm:$0xff]  ;;  %v237_v49 = vld [vmem:[#allocation7 + $0x78] sm:$0xff]  ;;  %v351_v20 = vld [vmem:[#allocation8] sm:$0xff] }
  0x55   :  { %640 = vmatpush3.bf16.msra.mxu0 %v639_v10  ;;  %v678_v50 = vpack.c.bf16 %v237_v49, %v236_v48  ;;  %v471_v51 = vld [vmem:[%s1036_s2] ss:$0 sm:$0xff]  ;;  %v208_v10 = vlaneseq  ;;  %v352_v21 = vld [vmem:[#allocation8 + $0x8] sm:$0xff]  ;;  %v353_v23 = vld [vmem:[#allocation8 + $0x10] sm:$0xff] }
  0x56   :  { %641 = vmatprep.subr.bf16.mxu0 %v846_v0  ;;  %661 = vmatpush3.bf16.msra.mxu1 %v660_v32  ;;  %v203_v12 = vld [vmem:[%s1037_s3] sm:$0x1]  ;;  %v356_v27 = vld [vmem:[#allocation8 + $0x28] sm:$0xff]  ;;  %v357_v29 = vld [vmem:[#allocation8 + $0x30] sm:$0xff] }
  0x57   :  { %662 = vmatprep.subr.bf16.mxu1 %v846_v0  ;;  %v990_v11 = vshrl.u32 %v208_v10, 7  ;;  %v472_v17 = vld [vmem:[%s1038_s4] ss:$0 sm:$0xff]  ;;  %v359_v32 = vld [vmem:[#allocation8 + $0x40] sm:$0xff]  ;;  %v360_v33 = vld [vmem:[#allocation8 + $0x48] sm:$0xff] }
  0x58   :  { %v354_v24 = vld [vmem:[#allocation8 + $0x18] sm:$0xff]  ;;  %v693_v34 = vpack.c.bf16 %v360_v33, %v359_v32  ;;  %v364_v39 = vld [vmem:[#allocation8 + $0x68] sm:$0xff] }
  0x59   :  { %643 = vmatpush3.bf16.msra.mxu0 %v642_v13  ;;  %v210_v13 = vsub.s32 0, %v990_v11  ;;  %v358_v30 = vld [vmem:[#allocation8 + $0x38] sm:$0xff] }
  0x5a   :  { %644 = vmatprep.subr.bf16.mxu0 %v846_v0  ;;  %664 = vmatpush3.bf16.msra.mxu1 %v663_v35  ;;  %v690_v31 = vpack.c.bf16 %v358_v30, %v357_v29  ;;  %v361_v35 = vld [vmem:[#allocation8 + $0x50] sm:$0xff]  ;;  %v362_v36 = vld [vmem:[#allocation8 + $0x58] sm:$0xff] }
  0x5b   :  { %665 = vmatprep.subr.bf16.mxu1 %v846_v0  ;;  %v696_v37 = vpack.c.bf16 %v362_v36, %v361_v35  ;;  %v366_v42 = vld [vmem:[#allocation8 + $0x78] sm:$0xff] }
  0x5d   :  { %646 = vmatpush3.bf16.msra.mxu0 %v645_v16 }
  0x5e   :  { %647 = vmatprep.subr.bf16.mxu0 %v846_v0  ;;  %667 = vmatpush3.bf16.msra.mxu1 %v666_v38  ;;  %v363_v38 = vld [vmem:[#allocation8 + $0x60] sm:$0xff] }
  0x5f   :  { %668 = vmatprep.subr.bf16.mxu1 %v846_v0  ;;  %v699_v40 = vpack.c.bf16 %v364_v39, %v363_v38 }
  0x61   :  { %649 = vmatpush3.bf16.msra.mxu0 %v648_v19 }
  0x62   :  { %650 = vmatprep.subr.bf16.mxu0 %v846_v0  ;;  %670 = vmatpush3.bf16.msra.mxu1 %v669_v41  ;;  %v365_v41 = vld [vmem:[#allocation8 + $0x70] sm:$0xff] }
  0x63   :  { %671 = vmatprep.subr.bf16.mxu1 %v846_v0  ;;  %v702_v43 = vpack.c.bf16 %v366_v42, %v365_v41 }
  0x65   :  { %652 = vmatpush3.bf16.msra.mxu0 %v651_v22  ;;  %v681_v22 = vpack.c.bf16 %v352_v21, %v351_v20 }
  0x66   :  { %653 = vmatprep.subr.bf16.mxu0 %v846_v0  ;;  %673 = vmatpush3.bf16.msra.mxu1 %v672_v44  ;;  %v473_v44 = vld [vmem:[%s1040_s6] ss:$0 sm:$0xff] }
  0x67   :  { %674 = vmatprep.subr.bf16.mxu1 %v846_v0 }
  0x69   :  { %655 = vmatpush3.bf16.msra.mxu0 %v654_v25  ;;  %v684_v25 = vpack.c.bf16 %v354_v24, %v353_v23 }
  0x6a   :  { %680 = vmatprep.subr.bf16.mxu0 %v846_v0  ;;  %676 = vmatpush3.bf16.msra.mxu1 %v675_v47 }
  0x6b   :  { %677 = vmatprep.subr.bf16.mxu1 %v846_v0 }
  0x6c   :  { %560 = vmatmul.mubr.f32.vlgmr.msra.gmra.mrb[0].mxu0 %v92_v26  ;;  %v355_v26 = vld [vmem:[#allocation8 + $0x20] sm:$0xff] }
  0x6d   :  { %629 = vmatprep.mubr.msk.f32.mxu0 %vm847_vm0, %v848_v1  ;;  %682 = vmatpush3.bf16.msra.mxu0 %v681_v22  ;;  %v687_v28 = vpack.c.bf16 %v356_v27, %v355_v26 }
  0x6e   :  { %679 = vmatpush3.bf16.msra.mxu1 %v678_v50  ;;  %683 = vmatprep.subr.bf16.mxu0 %v846_v0 }
  0x71   :  { %685 = vmatpush3.bf16.msra.mxu0 %v684_v25 }
  0x72   :  { %686 = vmatprep.subr.bf16.mxu0 %v846_v0 }
  0x75   :  { %688 = vmatpush3.bf16.msra.mxu0 %v687_v28 }
  0x76   :  { %689 = vmatprep.subr.bf16.mxu0 %v846_v0 }
  0x79   :  { %691 = vmatpush3.bf16.msra.mxu0 %v690_v31 }
  0x7a   :  { %692 = vmatprep.subr.bf16.mxu0 %v846_v0 }
  0x7d   :  { %694 = vmatpush3.bf16.msra.mxu0 %v693_v34 }
  0x7e   :  { %695 = vmatprep.subr.bf16.mxu0 %v846_v0 }
  0x81   :  { %697 = vmatpush3.bf16.msra.mxu0 %v696_v37 }
  0x82   :  { %698 = vmatprep.subr.bf16.mxu0 %v846_v0 }
  0x85   :  { %700 = vmatpush3.bf16.msra.mxu0 %v699_v40 }
  0x86   :  { %701 = vmatprep.subr.bf16.mxu0 %v846_v0 }
  0x89   :  { %703 = vmatpush3.bf16.msra.mxu0 %v702_v43 }
 0x13f   :  { %v182_v52 = vpop.f32.mrb[0].mxu0 }
 0x140   :  { %v183_v53 = vadd.f32 %v471_v51, %v182_v52  ;;  %v561_v54 = vpop.f32.mrb[1].mxu0 }
 0x142   :  { %v186_v55 = vmax.f32 %v183_v53, 0.0 }
 0x144   :  { %v187_v56 = vrot.slane %v186_v55, 4 }
 0x146   :  { %v188_v57 = vadd.f32 %v187_v56, %v186_v55 }
 0x148   :  { %v189_v58 = vrot.slane %v188_v57, 2 }
 0x14a   :  { %v190_v59 = vadd.f32 %v189_v58, %v188_v57 }
 0x14c   :  { %v191_v60 = vrot.slane %v190_v59, 1 }
 0x14e   :  { %v192_v61 = vadd.f32 %v191_v60, %v190_v59 }
 0x150   :  { %v193_v62 = vmul.f32 0.125, %v192_v61 }
 0x152   :  { %v194_v63 = vsub.f32 %v186_v55, %v193_v62 }
 0x154   :  { %v195_v1 = vmul.f32 %v194_v63, %v194_v63 }
 0x156   :  { %v196_v2 = vrot.slane %v195_v1, 4 }
 0x158   :  { %v197_v3 = vadd.f32 %v196_v2, %v195_v1  ;;  %v332_v2 = vld [vmem:[%s1041_s7] sm:$0x1]  ;;  %s849_s7 = smov [#allocation10]  }
 0x159   :  { %s460_s13 = sshll.u32 %s849_s7, 4  ;;  %s461_s13 = int_to_ptr.vmem [resolvable:$true] %s460_s13 }
 0x15a   :  { %v198_v4 = vrot.slane %v197_v3, 2  ;;  %p815_p5 = scmp.lt.s32.totalorder %s461_s13, %s461_s13 }
 0x15c   :  { %v199_v5 = vadd.f32 %v198_v4, %v197_v3 }
 0x15e   :  { %v200_v6 = vrot.slane %v199_v5, 1 }
 0x160   :  { %v201_v7 = vadd.f32 %v200_v6, %v199_v5  ;;  %v474_v6 = vld [vmem:[%s1042_s8] ss:$0 sm:$0xff]  ;;  %s810_s8 = scalar_lea.vmem %s461_s13, 128 }
 0x161   :  { %p811_p4 = scmp.ne.s32.totalorder %s461_s13, %s810_s8  ;;  %p816_p6 = scmp.lt.s32.totalorder %s810_s8, %s810_s8 }
 0x162   :  { %v202_v8 = vmul.f32 0.125, %v201_v7 }
 0x163   :  { %p817_p7 = por %p816_p6, %p815_p5 }
 0x164   :  { %v204_v9 = vadd.f32 1e-05, %v202_v8 }
 0x165   :  { %p818_p8 = pnand %p817_p7, %p811_p4 }
 0x166   :  { %714 = vrsqrt.f32 %v204_v9  ;;  %v475_v9 = vld [vmem:[%s1044_s10] ss:$0 sm:$0xff] }
 0x170   :  { %v715_v14 = vpop.eup %714 }
 0x171   :  { %v206_v15 = vmul.f32 %v715_v14, %v203_v12 }
 0x173   :  { %v211_v16 = vrot.slane %v206_v15, %v210_v13 }
 0x175   :  { %v213_v18 = vmul.f32 %v211_v16, %v194_v63 }
 0x177   :  { %v221_v19 = vadd.f32 %v472_v17, %v213_v18 }
 0x179   :  { %595 = vmatmul.mubr.f32.vlgmr.msra.gmra.mrb[0].mxu1 %v221_v19 }
 0x24c   :  { %v311_v45 = vpop.f32.mrb[0].mxu1 }
 0x24d   :  { %v312_v46 = vadd.f32 %v473_v44, %v311_v45  ;;  %v596_v47 = vpop.f32.mrb[1].mxu1 }
 0x24f   :  { %v315_v48 = vmax.f32 %v312_v46, 0.0 }
 0x251   :  { %v316_v49 = vrot.slane %v315_v48, 4 }
 0x253   :  { %v317_v50 = vadd.f32 %v316_v49, %v315_v48 }
 0x255   :  { %v318_v51 = vrot.slane %v317_v50, 2 }
 0x257   :  { %v319_v52 = vadd.f32 %v318_v51, %v317_v50 }
 0x259   :  { %v320_v53 = vrot.slane %v319_v52, 1 }
 0x25b   :  { %v321_v54 = vadd.f32 %v320_v53, %v319_v52 }
 0x25d   :  { %v322_v55 = vmul.f32 0.125, %v321_v54 }
 0x25f   :  { %v323_v0 = vsub.f32 %v315_v48, %v322_v55 }
 0x261   :  { %v324_v56 = vmul.f32 %v323_v0, %v323_v0 }
 0x263   :  { %v325_v57 = vrot.slane %v324_v56, 4 }
 0x265   :  { %v326_v58 = vadd.f32 %v325_v57, %v324_v56 }
 0x267   :  { %v327_v59 = vrot.slane %v326_v58, 2 }
 0x269   :  { %v328_v60 = vadd.f32 %v327_v59, %v326_v58 }
 0x26b   :  { %v329_v61 = vrot.slane %v328_v60, 1 }
 0x26d   :  { %v330_v62 = vadd.f32 %v329_v61, %v328_v60 }
 0x26f   :  { %v331_v63 = vmul.f32 0.125, %v330_v62 }
 0x271   :  { %v333_v1 = vadd.f32 1e-05, %v331_v63 }
 0x273   :  { %716 = vrsqrt.f32 %v333_v1 }
 0x27d   :  { %v717_v3 = vpop.eup %716 }
 0x27e   :  { %v335_v4 = vmul.f32 %v717_v3, %v332_v2 }
 0x280   :  { %v340_v5 = vrot.slane %v335_v4, %v210_v13 }
 0x282   :  { %v342_v7 = vmul.f32 %v340_v5, %v323_v0 }
 0x284   :  { %v350_v8 = vadd.f32 %v474_v6, %v342_v7 }
 0x286   :  { %630 = vmatmul.mubr.f32.vlgmr.msra.gmra.mrb[2].mxu0 %v350_v8 }
 0x359   :  { %v440_v10 = vpop.f32.mrb[2].mxu0 }
 0x35a   :  { %v441_v12 = vadd.f32 %v475_v9, %v440_v10  ;;  %v631_v14 = vpop.f32.mrb[3].mxu0 }
 0x35c   :  { %v444_v15 = vand.u32 2147483647, %v441_v12  ;;  %vm450_vm1 = vcmp.ge.f32.partialorder %v441_v12, 0.0 }
 0x35e   :  { %v445_v16 = vsub.f32 0.0, %v444_v15 }
 0x360   :  { %v446_v17 = vmul.f32 1.442695, %v445_v16 }
 0x362   :  { %718 = vpow2.f32 %v446_v17 }
 0x36c   :  { %v719_v11 = vpop.eup %718 }
 0x36d   :  { %v448_v13 = vadd.f32 1.0, %v719_v11 }
 0x36f   :  { %720 = vrcp.f32 %v448_v13 }
 0x379   :  { %v721_v18 = vpop.eup %720 }
 0x37a   :  { %v451_v19 = vmul.f32 %v721_v18, %v719_v11 }
 0x37c   :  { %v452_v20 = vsel %vm450_vm1, %v721_v18, %v451_v19 }
 0x37d   :  { %453 = vst [vmem:[#allocation10] sm:$0xff] %v452_v20 }
 0x37e   :  { %821 = shalt.err (!%p818_p8)
}
 0x37f   :  { %s822_s20 = scalar_lea.hbm %s1045_s11, 128 }
 0x380   :  { %p823_p9 = scmp.ne.s32.totalorder %s1045_s11, %s822_s20  ;;  %p826_p10 = scmp.lt.u32.totalorder %s822_s20, %s1045_s11 }
 0x382   :  { %p828_p11 = pnand %p826_p10, %p823_p9 }
 0x384   :  { %831 = shalt.err (!%p828_p11)
}
 0x385   :  { %463 = dma.vmem_to_hbm [thread:$0]  %s461_s13, 128, %s1045_s11, [#allocation4]  }
 0x386   :  { %838 = dma.done.wait [#allocation4], 128  }
 0x387   :  { %839 = vsyncadd [#allocation4], 4294967168 }
 0x388   :  { %467 = vsyncpa [#allocation3], 1 }
 0x389   :  { %468 = vsyncpa [#allocation6], 1 }
 0x38a   :  { %469 = vsyncpa [#allocation9], 1 }
 0x38b   :  { %470 = vsyncpa [#allocation4], 1 }

</bundles_post_ra>
